<compile_context>
chip_gen: v5e
topology: v5e:2x2
jax: 0.10.0
libtpu: 0.0.40
codegen_flags: <defaults>
</compile_context>

<pallas_src>
import functools

import jax
import jax.numpy as jnp
from jax import lax
from jax.experimental import pallas as pl
from jax.experimental.pallas import tpu as pltpu


_SQRT_HALF = 0.7071067811865476
_SQRT_2_OVER_PI = 0.7978845608028654


def _round_up(x, m):
    return ((x + m - 1) // m) * m


def _pick_n_tile(hidden, max_tile_n):
    """Largest lane-aligned (multiple-of-128) chunk <= max_tile_n that divides
    `hidden` exactly.  The feature axis is a reduction for the folded head, so a
    padded partial chunk would corrupt the score; fall back to one resident chunk."""
    if hidden <= max_tile_n:
        return hidden
    tn = (max_tile_n // 128) * 128
    while tn >= 128:
        if hidden % tn == 0:
            return tn
        tn -= 128
    return hidden


def _fuse_classifier_kernel(t_ref, e_ref, w1t_ref, w1e_ref, b1_ref, wd_ref,
                            bd_ref, pred_ref, acc_ref, *, compute_dtype,
                            use_tanh_gelu):
    # Grid = (batch tiles [parallel], feature chunks [arbitrary / reduction]).
    # t_ref:  [TB, Ht]   e_ref:  [TB, He]      activation tiles, native dtype
    # w1t_ref:[Ht, TN]   w1e_ref:[He, TN]      first-layer weight chunk (bf16, K-split)
    # b1_ref: [1, TN] f32
    # wd_ref: [1, TN] f32 = (w2[:,1]-w2[:,0]) chunk    bd_ref: [1, 1] f32 = b2[1]-b2[0]
    # pred_ref: [1, TB] int32 (lane-dense predicted labels)
    # acc_ref:  [1, TB] f32 VMEM scratch (running score)
    n = pl.program_id(1)

    @pl.when(n == 0)
    def _():
        acc_ref[...] = jnp.zeros_like(acc_ref)

    # Activations arrive in their native dtype (no wrapper-side cast/pad HBM
    # pass); cast to bf16 here so the MXU runs at bf16 peak, accumulate in f32.
    t = t_ref[...].astype(compute_dtype)
    e = e_ref[...].astype(compute_dtype)

    # Linear-1 for this output-feature chunk; K split over (tensors, emrs) so
    # the fused feature never makes an HBM round trip.
    h = jnp.dot(t, w1t_ref[...], preferred_element_type=jnp.float32)
    h = h + jnp.dot(e, w1e_ref[...], preferred_element_type=jnp.float32)
    h = h + b1_ref[...]

    if use_tanh_gelu:
        # Optional tanh-approx GELU: routes the transcendental to the EUP slot,
        # relieving the VALU for small H.  Slightly different numerics from
        # torch.nn.GELU(approximate='none'), so gated behind a flag.
        h3 = h * h * h
        h = 0.5 * h * (1.0 + jnp.tanh(_SQRT_2_OVER_PI * (h + 0.044715 * h3)))
    else:
        # Exact erf-form GELU, matching torch.nn.GELU(approximate='none').
        h = 0.5 * h * (1.0 + lax.erf(h * _SQRT_HALF))
    # Dropout: identity at inference.

    # Folded 2-class head: partial score = h_chunk @ wd_chunk.  Contract wd's
    # feature axis against h's feature axis so the result lands as [1, TB]
    # (batch on the lane axis -> lane-dense, unmasked stores).
    acc_ref[...] += lax.dot_general(
        wd_ref[...], h,
        dimension_numbers=(((1,), (1,)), ((), ())),
        preferred_element_type=jnp.float32)

    @pl.when(n == pl.num_programs(1) - 1)
    def _():
        score = acc_ref[...] + bd_ref[...]
        # argmax over 2 classes == (logit1 > logit0) == (score > 0); ties -> 0,
        # matching torch.argmax first-max behavior.
        pred_ref[...] = (score > 0.0).astype(jnp.int32)


def prepare_fuse_model_1_params(w1, b1, w2, b2, tensors_dim, *,
                                compute_dtype=jnp.bfloat16):
    """One-time parameter preprocessing (hoisted out of the forward path so the
    per-call cost is only the kernel's own HBM reads).

      w1: [H, H], b1: [H]  (classifier[0]);  w2: [H, 2], b2: [2]  (classifier[3])
      tensors_dim: features contributed by `tensors` (emrs supply H - tensors_dim).
    """
    H = w1.shape[0]
    ht = int(tensors_dim)
    he = H - ht
    assert 0 < ht < H and w1.shape == (H, H) and w2.shape == (H, 2)

    w2f = w2.astype(jnp.float32)
    b2f = b2.reshape(-1).astype(jnp.float32)
    return {
        "ht": ht, "he": he, "H": H, "compute_dtype": compute_dtype,
        # First layer: K-split at the (tensors | emrs) boundary, bf16 for the MXU.
        "w1t": w1[:ht, :].astype(compute_dtype),          # [Ht, H]
        "w1e": w1[ht:, :].astype(compute_dtype),          # [He, H]
        "b1": b1.reshape(1, H).astype(jnp.float32),       # [1, H]
        # 2-class head folded into a single score-difference vector.
        "wd": (w2f[:, 1] - w2f[:, 0]).reshape(1, H),      # [1, H]
        "bd": (b2f[1] - b2f[0]).reshape(1, 1),            # [1, 1]
    }


def fuse_model_1_apply(params, tensors, emrs, *, tile_b=512, max_tile_n=512,
                       use_tanh_gelu=False):
    """FuseModel_1.forward (labels=None path).  Returns pred_labels: [B] int32."""
    ht, he, H = params["ht"], params["he"], params["H"]
    B = tensors.shape[0]
    assert tensors.shape == (B, ht) and emrs.shape == (B, he)

    # ---- batch tiling: no wrapper-side pad, Pallas masks the partial block ----
    if B <= 128:
        tb = B                      # single tile; block dims == full array dims
    else:
        # Lane-aligned tiles; guarantee >= 2 grid steps so both v7x TensorCores
        # get work under dimension_semantics=("parallel", ...).
        tb = min(tile_b, _round_up(pl.cdiv(B, 2), 128))
    num_b = pl.cdiv(B, tb)

    # ---- output-feature (N) tiling over H: streams weight column chunks and
    # ---- caps VMEM at O(tb*tn) so large hidden sizes fit v7x's 64 MiB budget.
    tn = _pick_n_tile(H, max_tile_n)
    num_n = H // tn
    weights_resident = (num_n == 1)

    # ---- per-generation VMEM budget ------------------------------------------
    try:
        vmem_cap = pltpu.get_tpu_info().vmem_capacity_bytes
        vmem_limit = int(vmem_cap * 3 // 4)   # ~96 MiB on v5e/v6e, ~48 MiB on v7x
    except Exception:  # noqa: BLE001 - hardware query is best-effort
        vmem_limit = 64 * 1024 * 1024

    kernel = functools.partial(
        _fuse_classifier_kernel,
        compute_dtype=params["compute_dtype"],
        use_tanh_gelu=use_tanh_gelu)

    def build(single_buffer_resident):
        if single_buffer_resident:
            # Constant-index (resident) weight blocks only need one buffer.
            def w_spec(shape, imap):
                return pl.BlockSpec(shape, imap, pipeline_mode=pl.Buffered(1))
        else:
            # Streamed weight chunks keep default double-buffering.
            def w_spec(shape, imap):
                return pl.BlockSpec(shape, imap)
        return pl.pallas_call(
            kernel,
            out_shape=jax.ShapeDtypeStruct((1, B), jnp.int32),
            grid=(num_b, num_n),
            in_specs=[
                pl.BlockSpec((tb, ht), lambda i, n: (i, 0)),   # tensors tile
                pl.BlockSpec((tb, he), lambda i, n: (i, 0)),   # emrs tile
                w_spec((ht, tn), lambda i, n: (0, n)),         # w1 rows for tensors
                w_spec((he, tn), lambda i, n: (0, n)),         # w1 rows for emrs
                w_spec((1, tn), lambda i, n: (0, n)),          # b1 chunk
                w_spec((1, tn), lambda i, n: (0, n)),          # folded class-diff w
                w_spec((1, 1), lambda i, n: (0, 0)),           # folded class-diff b
            ],
            out_specs=pl.BlockSpec((1, tb), lambda i, n: (0, i)),   # lane-dense preds
            scratch_shapes=[pltpu.VMEM((1, tb), jnp.float32)],      # score accumulator
            compiler_params=pltpu.CompilerParams(
                dimension_semantics=("parallel", "arbitrary"),
                vmem_limit_bytes=vmem_limit,
            ),
        )

    args = (tensors, emrs, params["w1t"], params["w1e"], params["b1"],
            params["wd"], params["bd"])
    if weights_resident:
        try:
            pred = build(True)(*args)
        except Exception:  # noqa: BLE001 - pipeline_mode unsupported -> default buffering
            pred = build(False)(*args)
    else:
        pred = build(False)(*args)

    return pred[0, :B]   # [B] int32, same as torch.argmax(prob_vector, dim=1)


def fuse_model_1_forward(tensors, emrs, w1, b1, w2, b2, **kwargs):
    """Convenience one-shot wrapper.  In a serving loop, call
    prepare_fuse_model_1_params() once and reuse it with fuse_model_1_apply()."""
    params = prepare_fuse_model_1_params(w1, b1, w2, b2, tensors.shape[1])
    return fuse_model_1_apply(params, tensors, emrs, **kwargs)


if __name__ == "__main__":
    key = jax.random.PRNGKey(0)

    def make_case(k, batch, ht, he):
        H = ht + he
        ks = jax.random.split(k, 6)
        scale = 1.0 / (H ** 0.5)
        tensors = jax.random.normal(ks[0], (batch, ht), dtype=jnp.float32)
        emrs = jax.random.normal(ks[1], (batch, he), dtype=jnp.float32)
        w1 = jax.random.uniform(ks[2], (H, H), minval=-scale, maxval=scale,
                                dtype=jnp.float32)
        b1 = jax.random.uniform(ks[3], (H,), minval=-scale, maxval=scale,
                                dtype=jnp.float32)
        w2 = jax.random.uniform(ks[4], (H, 2), minval=-scale, maxval=scale,
                                dtype=jnp.float32)
        b2 = jax.random.uniform(ks[5], (2,), minval=-scale, maxval=scale,
                                dtype=jnp.float32)
        return tensors, emrs, w1, b1, w2, b2

    def ref_labels_and_margin(tensors, emrs, w1, b1, w2, b2):
        # Pure-JAX reference with the same bf16-operand / f32-accumulate numerics.
        fuse = jnp.concatenate([tensors, emrs], axis=-1)
        h = jnp.dot(fuse.astype(jnp.bfloat16), w1.astype(jnp.bfloat16),
                    preferred_element_type=jnp.float32) + b1[None, :]
        h = 0.5 * h * (1.0 + lax.erf(h * _SQRT_HALF))
        logits = h @ w2 + b2[None, :]
        labels = jnp.argmax(logits, axis=1).astype(jnp.int32)
        margin = jnp.abs(logits[:, 1] - logits[:, 0])
        return labels, margin

    def check_case(k, batch, ht, he, **kwargs):
        tensors, emrs, w1, b1, w2, b2 = make_case(k, batch, ht, he)
        params = prepare_fuse_model_1_params(w1, b1, w2, b2, tensors_dim=ht)
        pred = fuse_model_1_apply(params, tensors, emrs, **kwargs)
        pred = jax.block_until_ready(pred)
        assert pred.shape == (batch,)
        assert pred.dtype == jnp.int32
        ref, margin = ref_labels_and_margin(tensors, emrs, w1, b1, w2, b2)
        # Labels must agree everywhere except (possibly) samples sitting right on
        # the decision boundary, where rounding-order differences between the
        # kernel and the reference can legitimately flip the argmax.
        ok = (pred == ref) | (margin < 1e-3)
        assert bool(jnp.all(ok))
        assert float(jnp.mean((pred == ref).astype(jnp.float32))) > 0.98

    k1, k2 = jax.random.split(key)
    # Small config: hidden_size = 32, tensors/emrs each contribute 16 features,
    # batch 8.  Exercises the fully-resident single-buffered weight path.
    check_case(k1, batch=8, ht=16, he=16)
    # Exercises the tiled paths: 2 batch tiles (second one partial / masked) x
    # 2 streamed feature chunks with the score accumulator.
    check_case(k2, batch=300, ht=128, he=128, max_tile_n=128)

    # TODO(synk): the labels/loss branch of FuseModel_1.forward references
    # self.loss_func, which is never defined in the original module; only the
    # inference (labels=None) path is implemented. Training-mode dropout is
    # likewise omitted (identity at inference).
    print("KERNEL_OK")
</pallas_src>

<mosaic_0001>
module attributes {stable_mosaic.version = 11 : i64} {
  func.func @_fuse_classifier_kernel(%arg0: i32, %arg1: i32, %arg2: memref<8x16xf32, #tpu.memory_space<vmem>>, %arg3: memref<8x16xf32, #tpu.memory_space<vmem>>, %arg4: memref<16x32xbf16, #tpu.memory_space<vmem>>, %arg5: memref<16x32xbf16, #tpu.memory_space<vmem>>, %arg6: memref<1x32xf32, #tpu.memory_space<vmem>>, %arg7: memref<1x32xf32, #tpu.memory_space<vmem>>, %arg8: memref<1x1xf32, #tpu.memory_space<vmem>>, %arg9: memref<1x8xi32, #tpu.memory_space<vmem>>, %arg10: memref<1x8xf32, #tpu.memory_space<vmem>>) attributes {dimension_semantics = [#tpu.dimension_semantics<parallel>, #tpu.dimension_semantics<arbitrary>], iteration_bounds = array<i64: 1, 1>, scalar_prefetch = 0 : i64, scratch_operands = 1 : i64, tpu.core_type = #tpu.core_type<tc>, window_params = [{transform_indices = @transform_0, window_bounds = array<i64: 8, 16>}, {transform_indices = @transform_1, window_bounds = array<i64: 8, 16>}, {pipeline_mode = #tpu.pipeline_mode<synchronous>, transform_indices = @transform_2, window_bounds = array<i64: 16, 32>}, {pipeline_mode = #tpu.pipeline_mode<synchronous>, transform_indices = @transform_3, window_bounds = array<i64: 16, 32>}, {pipeline_mode = #tpu.pipeline_mode<synchronous>, transform_indices = @transform_4, window_bounds = array<i64: 1, 32>}, {pipeline_mode = #tpu.pipeline_mode<synchronous>, transform_indices = @transform_5, window_bounds = array<i64: 1, 32>}, {pipeline_mode = #tpu.pipeline_mode<synchronous>, transform_indices = @transform_6, window_bounds = array<i64: 1, 1>}, {transform_indices = @transform_7, window_bounds = array<i64: 1, 8>}]} {
    %c0_i32 = arith.constant 0 : i32
    %0 = arith.cmpi eq, %arg1, %c0_i32 : i32
    %1 = arith.extui %0 : i1 to i32
    %c0_i32_0 = arith.constant 0 : i32
    %2 = arith.cmpi ne, %1, %c0_i32_0 : i32
    scf.if %2 {
      %cst_23 = arith.constant 0.000000e+00 : f32
      %31 = vector.broadcast %cst_23 : f32 to vector<1x8xf32>
      %c0_24 = arith.constant 0 : index
      %c0_25 = arith.constant 0 : index
      %32 = vector.load %arg10[%c0_24, %c0_25] : memref<1x8xf32, #tpu.memory_space<vmem>>, vector<1x8xf32>
      tpu.vector_store %arg10[%c0_24, %c0_25], %31 {strides = array<i32>} : memref<1x8xf32, #tpu.memory_space<vmem>>, vector<1x8xf32>,
    } else {
    }
    %c0 = arith.constant 0 : index
    %c0_1 = arith.constant 0 : index
    %3 = vector.load %arg2[%c0, %c0_1] : memref<8x16xf32, #tpu.memory_space<vmem>>, vector<8x16xf32>
    %4 = arith.truncf %3 : vector<8x16xf32> to vector<8x16xbf16>
    %c0_2 = arith.constant 0 : index
    %c0_3 = arith.constant 0 : index
    %5 = vector.load %arg3[%c0_2, %c0_3] : memref<8x16xf32, #tpu.memory_space<vmem>>, vector<8x16xf32>
    %6 = arith.truncf %5 : vector<8x16xf32> to vector<8x16xbf16>
    %c0_4 = arith.constant 0 : index
    %c0_5 = arith.constant 0 : index
    %7 = vector.load %arg4[%c0_4, %c0_5] : memref<16x32xbf16, #tpu.memory_space<vmem>>, vector<16x32xbf16>
    %cst = arith.constant dense<0.000000e+00> : vector<8x32xf32>
    %8 = tpu.matmul %4, %7, %cst {dimension_numbers = #tpu.dot_dimension_numbers<[1], [0], [0], [1], [0, 0, 1, 1], [], []>} : vector<8x16xbf16>, vector<16x32xbf16>, vector<8x32xf32> -> vector<8x32xf32>
    %c0_6 = arith.constant 0 : index
    %c0_7 = arith.constant 0 : index
    %9 = vector.load %arg5[%c0_6, %c0_7] : memref<16x32xbf16, #tpu.memory_space<vmem>>, vector<16x32xbf16>
    %cst_8 = arith.constant dense<0.000000e+00> : vector<8x32xf32>
    %10 = tpu.matmul %6, %9, %cst_8 {dimension_numbers = #tpu.dot_dimension_numbers<[1], [0], [0], [1], [0, 0, 1, 1], [], []>} : vector<8x16xbf16>, vector<16x32xbf16>, vector<8x32xf32> -> vector<8x32xf32>
    %11 = arith.addf %8, %10 : vector<8x32xf32>
    %c0_9 = arith.constant 0 : index
    %c0_10 = arith.constant 0 : index
    %12 = vector.load %arg6[%c0_9, %c0_10] : memref<1x32xf32, #tpu.memory_space<vmem>>, vector<1x32xf32>
    %13 = vector.broadcast %12 : vector<1x32xf32> to vector<8x32xf32>
    %14 = arith.addf %11, %13 : vector<8x32xf32>
    %cst_11 = arith.constant 5.000000e-01 : f32
    %15 = vector.broadcast %cst_11 : f32 to vector<8x32xf32>
    %16 = arith.mulf %15, %14 : vector<8x32xf32>
    %cst_12 = arith.constant 0.707106769 : f32
    %17 = vector.broadcast %cst_12 : f32 to vector<8x32xf32>
    %18 = arith.mulf %14, %17 : vector<8x32xf32>
    %19 = math.erf %18 : vector<8x32xf32>
    %cst_13 = arith.constant 1.000000e+00 : f32
    %20 = vector.broadcast %cst_13 : f32 to vector<8x32xf32>
    %21 = arith.addf %20, %19 : vector<8x32xf32>
    %22 = arith.mulf %16, %21 : vector<8x32xf32>
    %c0_14 = arith.constant 0 : index
    %c0_15 = arith.constant 0 : index
    %23 = vector.load %arg10[%c0_14, %c0_15] : memref<1x8xf32, #tpu.memory_space<vmem>>, vector<1x8xf32>
    %c0_16 = arith.constant 0 : index
    %c0_17 = arith.constant 0 : index
    %24 = vector.load %arg7[%c0_16, %c0_17] : memref<1x32xf32, #tpu.memory_space<vmem>>, vector<1x32xf32>
    %cst_18 = arith.constant dense<0.000000e+00> : vector<1x8xf32>
    %25 = tpu.matmul %24, %22, %cst_18 {dimension_numbers = #tpu.dot_dimension_numbers<[1], [1], [0], [0], [0, 0, 1, 0], [], []>} : vector<1x32xf32>, vector<8x32xf32>, vector<1x8xf32> -> vector<1x8xf32>
    %26 = arith.addf %23, %25 : vector<1x8xf32>
    %c0_19 = arith.constant 0 : index
    %c0_20 = arith.constant 0 : index
    %27 = vector.load %arg10[%c0_19, %c0_20] : memref<1x8xf32, #tpu.memory_space<vmem>>, vector<1x8xf32>
    tpu.vector_store %arg10[%c0_19, %c0_20], %26 {strides = array<i32>} : memref<1x8xf32, #tpu.memory_space<vmem>>, vector<1x8xf32>,
    %c0_i32_21 = arith.constant 0 : i32
    %28 = arith.cmpi eq, %arg1, %c0_i32_21 : i32
    %29 = arith.extui %28 : i1 to i32
    %c0_i32_22 = arith.constant 0 : i32
    %30 = arith.cmpi ne, %29, %c0_i32_22 : i32
    scf.if %30 {
      %c0_23 = arith.constant 0 : index
      %c0_24 = arith.constant 0 : index
      %31 = vector.load %arg10[%c0_23, %c0_24] : memref<1x8xf32, #tpu.memory_space<vmem>>, vector<1x8xf32>
      %c0_25 = arith.constant 0 : index
      %c0_26 = arith.constant 0 : index
      %32 = vector.load %arg8[%c0_25, %c0_26] : memref<1x1xf32, #tpu.memory_space<vmem>>, vector<1x1xf32>
      %33 = vector.broadcast %32 : vector<1x1xf32> to vector<1x8xf32>
      %34 = arith.addf %31, %33 : vector<1x8xf32>
      %cst_27 = arith.constant 0.000000e+00 : f32
      %35 = vector.broadcast %cst_27 : f32 to vector<1x8xf32>
      %36 = arith.cmpf ogt, %34, %35 : vector<1x8xf32>
      %37 = arith.extui %36 : vector<1x8xi1> to vector<1x8xi32>
      %c0_28 = arith.constant 0 : index
      %c0_29 = arith.constant 0 : index
      %38 = vector.load %arg9[%c0_28, %c0_29] : memref<1x8xi32, #tpu.memory_space<vmem>>, vector<1x8xi32>
      tpu.vector_store %arg9[%c0_28, %c0_29], %37 {strides = array<i32>} : memref<1x8xi32, #tpu.memory_space<vmem>>, vector<1x8xi32>,
    } else {
    }
    return
  }
  func.func @transform_0(%arg0: i32, %arg1: i32) -> (i32, i32) {
    %c0_i32 = arith.constant 0 : i32
    %c0_i32_0 = arith.constant 0 : i32
    return %arg0, %c0_i32 : i32, i32
  }
  func.func @transform_1(%arg0: i32, %arg1: i32) -> (i32, i32) {
    %c0_i32 = arith.constant 0 : i32
    %c0_i32_0 = arith.constant 0 : i32
    return %arg0, %c0_i32 : i32, i32
  }
  func.func @transform_2(%arg0: i32, %arg1: i32) -> (i32, i32) {
    %c0_i32 = arith.constant 0 : i32
    %c0_i32_0 = arith.constant 0 : i32
    return %c0_i32, %arg1 : i32, i32
  }
  func.func @transform_3(%arg0: i32, %arg1: i32) -> (i32, i32) {
    %c0_i32 = arith.constant 0 : i32
    %c0_i32_0 = arith.constant 0 : i32
    return %c0_i32, %arg1 : i32, i32
  }
  func.func @transform_4(%arg0: i32, %arg1: i32) -> (i32, i32) {
    %c0_i32 = arith.constant 0 : i32
    %c0_i32_0 = arith.constant 0 : i32
    return %c0_i32, %arg1 : i32, i32
  }
  func.func @transform_5(%arg0: i32, %arg1: i32) -> (i32, i32) {
    %c0_i32 = arith.constant 0 : i32
    %c0_i32_0 = arith.constant 0 : i32
    return %c0_i32, %arg1 : i32, i32
  }
  func.func @transform_6(%arg0: i32, %arg1: i32) -> (i32, i32) {
    %c0_i32 = arith.constant 0 : i32
    %c0_i32_0 = arith.constant 0 : i32
    %c0_i32_1 = arith.constant 0 : i32
    return %c0_i32, %c0_i32_0 : i32, i32
  }
  func.func @transform_7(%arg0: i32, %arg1: i32) -> (i32, i32) {
    %c0_i32 = arith.constant 0 : i32
    %c0_i32_0 = arith.constant 0 : i32
    return %c0_i32, %arg0 : i32, i32
  }
}

module attributes {stable_mosaic.version = 11 : i64} {
  func.func @_fuse_classifier_kernel(%arg0: i32, %arg1: i32, %arg2: memref<8x16xf32, #tpu.memory_space<vmem>>, %arg3: memref<8x16xf32, #tpu.memory_space<vmem>>, %arg4: memref<16x32xbf16, #tpu.memory_space<vmem>>, %arg5: memref<16x32xbf16, #tpu.memory_space<vmem>>, %arg6: memref<1x32xf32, #tpu.memory_space<vmem>>, %arg7: memref<1x32xf32, #tpu.memory_space<vmem>>, %arg8: memref<1x1xf32, #tpu.memory_space<vmem>>, %arg9: memref<1x8xi32, #tpu.memory_space<vmem>>, %arg10: memref<1x8xf32, #tpu.memory_space<vmem>>) attributes {dimension_semantics = [#tpu.dimension_semantics<parallel>, #tpu.dimension_semantics<arbitrary>], iteration_bounds = array<i64: 1, 1>, scalar_prefetch = 0 : i64, scratch_operands = 1 : i64, tpu.core_type = #tpu.core_type<tc>, window_params = [{transform_indices = @transform_0, window_bounds = array<i64: 8, 16>}, {transform_indices = @transform_1, window_bounds = array<i64: 8, 16>}, {transform_indices = @transform_2, window_bounds = array<i64: 16, 32>}, {transform_indices = @transform_3, window_bounds = array<i64: 16, 32>}, {transform_indices = @transform_4, window_bounds = array<i64: 1, 32>}, {transform_indices = @transform_5, window_bounds = array<i64: 1, 32>}, {pipeline_mode = #tpu.pipeline_mode<synchronous>, transform_indices = @transform_6, window_bounds = array<i64: 1, 1>}, {transform_indices = @transform_7, window_bounds = array<i64: 1, 8>}]} {
    %c0_i32 = arith.constant 0 : i32
    %0 = arith.cmpi eq, %arg1, %c0_i32 : i32
    %1 = arith.extui %0 : i1 to i32
    %c0_i32_0 = arith.constant 0 : i32
    %2 = arith.cmpi ne, %1, %c0_i32_0 : i32
    scf.if %2 {
      %cst_23 = arith.constant 0.000000e+00 : f32
      %31 = vector.broadcast %cst_23 : f32 to vector<1x8xf32>
      %c0_24 = arith.constant 0 : index
      %c0_25 = arith.constant 0 : index
      %32 = vector.load %arg10[%c0_24, %c0_25] : memref<1x8xf32, #tpu.memory_space<vmem>>, vector<1x8xf32>
      tpu.vector_store %arg10[%c0_24, %c0_25], %31 {strides = array<i32>} : memref<1x8xf32, #tpu.memory_space<vmem>>, vector<1x8xf32>,
    } else {
    }
    %c0 = arith.constant 0 : index
    %c0_1 = arith.constant 0 : index
    %3 = vector.load %arg2[%c0, %c0_1] : memref<8x16xf32, #tpu.memory_space<vmem>>, vector<8x16xf32>
    %4 = arith.truncf %3 : vector<8x16xf32> to vector<8x16xbf16>
    %c0_2 = arith.constant 0 : index
    %c0_3 = arith.constant 0 : index
    %5 = vector.load %arg3[%c0_2, %c0_3] : memref<8x16xf32, #tpu.memory_space<vmem>>, vector<8x16xf32>
    %6 = arith.truncf %5 : vector<8x16xf32> to vector<8x16xbf16>
    %c0_4 = arith.constant 0 : index
    %c0_5 = arith.constant 0 : index
    %7 = vector.load %arg4[%c0_4, %c0_5] : memref<16x32xbf16, #tpu.memory_space<vmem>>, vector<16x32xbf16>
    %cst = arith.constant dense<0.000000e+00> : vector<8x32xf32>
    %8 = tpu.matmul %4, %7, %cst {dimension_numbers = #tpu.dot_dimension_numbers<[1], [0], [0], [1], [0, 0, 1, 1], [], []>} : vector<8x16xbf16>, vector<16x32xbf16>, vector<8x32xf32> -> vector<8x32xf32>
    %c0_6 = arith.constant 0 : index
    %c0_7 = arith.constant 0 : index
    %9 = vector.load %arg5[%c0_6, %c0_7] : memref<16x32xbf16, #tpu.memory_space<vmem>>, vector<16x32xbf16>
    %cst_8 = arith.constant dense<0.000000e+00> : vector<8x32xf32>
    %10 = tpu.matmul %6, %9, %cst_8 {dimension_numbers = #tpu.dot_dimension_numbers<[1], [0], [0], [1], [0, 0, 1, 1], [], []>} : vector<8x16xbf16>, vector<16x32xbf16>, vector<8x32xf32> -> vector<8x32xf32>
    %11 = arith.addf %8, %10 : vector<8x32xf32>
    %c0_9 = arith.constant 0 : index
    %c0_10 = arith.constant 0 : index
    %12 = vector.load %arg6[%c0_9, %c0_10] : memref<1x32xf32, #tpu.memory_space<vmem>>, vector<1x32xf32>
    %13 = vector.broadcast %12 : vector<1x32xf32> to vector<8x32xf32>
    %14 = arith.addf %11, %13 : vector<8x32xf32>
    %cst_11 = arith.constant 5.000000e-01 : f32
    %15 = vector.broadcast %cst_11 : f32 to vector<8x32xf32>
    %16 = arith.mulf %15, %14 : vector<8x32xf32>
    %cst_12 = arith.constant 0.707106769 : f32
    %17 = vector.broadcast %cst_12 : f32 to vector<8x32xf32>
    %18 = arith.mulf %14, %17 : vector<8x32xf32>
    %19 = math.erf %18 : vector<8x32xf32>
    %cst_13 = arith.constant 1.000000e+00 : f32
    %20 = vector.broadcast %cst_13 : f32 to vector<8x32xf32>
    %21 = arith.addf %20, %19 : vector<8x32xf32>
    %22 = arith.mulf %16, %21 : vector<8x32xf32>
    %c0_14 = arith.constant 0 : index
    %c0_15 = arith.constant 0 : index
    %23 = vector.load %arg10[%c0_14, %c0_15] : memref<1x8xf32, #tpu.memory_space<vmem>>, vector<1x8xf32>
    %c0_16 = arith.constant 0 : index
    %c0_17 = arith.constant 0 : index
    %24 = vector.load %arg7[%c0_16, %c0_17] : memref<1x32xf32, #tpu.memory_space<vmem>>, vector<1x32xf32>
    %cst_18 = arith.constant dense<0.000000e+00> : vector<1x8xf32>
    %25 = tpu.matmul %24, %22, %cst_18 {dimension_numbers = #tpu.dot_dimension_numbers<[1], [1], [0], [0], [0, 0, 1, 0], [], []>} : vector<1x32xf32>, vector<8x32xf32>, vector<1x8xf32> -> vector<1x8xf32>
    %26 = arith.addf %23, %25 : vector<1x8xf32>
    %c0_19 = arith.constant 0 : index
    %c0_20 = arith.constant 0 : index
    %27 = vector.load %arg10[%c0_19, %c0_20] : memref<1x8xf32, #tpu.memory_space<vmem>>, vector<1x8xf32>
    tpu.vector_store %arg10[%c0_19, %c0_20], %26 {strides = array<i32>} : memref<1x8xf32, #tpu.memory_space<vmem>>, vector<1x8xf32>,
    %c0_i32_21 = arith.constant 0 : i32
    %28 = arith.cmpi eq, %arg1, %c0_i32_21 : i32
    %29 = arith.extui %28 : i1 to i32
    %c0_i32_22 = arith.constant 0 : i32
    %30 = arith.cmpi ne, %29, %c0_i32_22 : i32
    scf.if %30 {
      %c0_23 = arith.constant 0 : index
      %c0_24 = arith.constant 0 : index
      %31 = vector.load %arg10[%c0_23, %c0_24] : memref<1x8xf32, #tpu.memory_space<vmem>>, vector<1x8xf32>
      %c0_25 = arith.constant 0 : index
      %c0_26 = arith.constant 0 : index
      %32 = vector.load %arg8[%c0_25, %c0_26] : memref<1x1xf32, #tpu.memory_space<vmem>>, vector<1x1xf32>
      %33 = vector.broadcast %32 : vector<1x1xf32> to vector<1x8xf32>
      %34 = arith.addf %31, %33 : vector<1x8xf32>
      %cst_27 = arith.constant 0.000000e+00 : f32
      %35 = vector.broadcast %cst_27 : f32 to vector<1x8xf32>
      %36 = arith.cmpf ogt, %34, %35 : vector<1x8xf32>
      %37 = arith.extui %36 : vector<1x8xi1> to vector<1x8xi32>
      %c0_28 = arith.constant 0 : index
      %c0_29 = arith.constant 0 : index
      %38 = vector.load %arg9[%c0_28, %c0_29] : memref<1x8xi32, #tpu.memory_space<vmem>>, vector<1x8xi32>
      tpu.vector_store %arg9[%c0_28, %c0_29], %37 {strides = array<i32>} : memref<1x8xi32, #tpu.memory_space<vmem>>, vector<1x8xi32>,
    } else {
    }
    return
  }
  func.func @transform_0(%arg0: i32, %arg1: i32) -> (i32, i32) {
    %c0_i32 = arith.constant 0 : i32
    %c0_i32_0 = arith.constant 0 : i32
    return %arg0, %c0_i32 : i32, i32
  }
  func.func @transform_1(%arg0: i32, %arg1: i32) -> (i32, i32) {
    %c0_i32 = arith.constant 0 : i32
    %c0_i32_0 = arith.constant 0 : i32
    return %arg0, %c0_i32 : i32, i32
  }
  func.func @transform_2(%arg0: i32, %arg1: i32) -> (i32, i32) {
    %c0_i32 = arith.constant 0 : i32
    %c0_i32_0 = arith.constant 0 : i32
    return %c0_i32, %arg1 : i32, i32
  }
  func.func @transform_3(%arg0: i32, %arg1: i32) -> (i32, i32) {
    %c0_i32 = arith.constant 0 : i32
    %c0_i32_0 = arith.constant 0 : i32
    return %c0_i32, %arg1 : i32, i32
  }
  func.func @transform_4(%arg0: i32, %arg1: i32) -> (i32, i32) {
    %c0_i32 = arith.constant 0 : i32
    %c0_i32_0 = arith.constant 0 : i32
    return %c0_i32, %arg1 : i32, i32
  }
  func.func @transform_5(%arg0: i32, %arg1: i32) -> (i32, i32) {
    %c0_i32 = arith.constant 0 : i32
    %c0_i32_0 = arith.constant 0 : i32
    return %c0_i32, %arg1 : i32, i32
  }
  func.func @transform_6(%arg0: i32, %arg1: i32) -> (i32, i32) {
    %c0_i32 = arith.constant 0 : i32
    %c0_i32_0 = arith.constant 0 : i32
    %c0_i32_1 = arith.constant 0 : i32
    return %c0_i32, %c0_i32_0 : i32, i32
  }
  func.func @transform_7(%arg0: i32, %arg1: i32) -> (i32, i32) {
    %c0_i32 = arith.constant 0 : i32
    %c0_i32_0 = arith.constant 0 : i32
    return %c0_i32, %arg0 : i32, i32
  }
}

</mosaic_0001>

<bundles_post_ra>
// kernel: tpu_custom_call.1
= control target key start
LH: loop header
LB: loop body
LE: loop exit
PB: predicated region body
PF: predicated region fallthrough
CT: control target
= control target key end

     0   :  { %s495_s0 = inlined_call_operand.hbm [shape: f32[8,16], index: 0, kind: input, shape index: {}]   ;;  %s496_s1 = inlined_call_operand.hbm [shape: f32[8,16], index: 1, kind: input, shape index: {}]   ;;  %s497_s2 = inlined_call_operand.hbm [shape: bf16[16,32], index: 2, kind: input, shape index: {}]   ;;  %s498_s3 = inlined_call_operand.hbm [shape: bf16[16,32], index: 3, kind: input, shape index: {}]   ;;  %s499_s4 = inlined_call_operand.vmem [shape: f32[1,32], index: 4, kind: input, shape index: {}]   ;;  %s500_s5 = inlined_call_operand.vmem [shape: f32[1,32], index: 5, kind: input, shape index: {}]   ;;  %s501_s6 = inlined_call_operand.<no memory space> [shape: f32[1,1], index: 6, kind: input, shape index: {}]   ;;  %s502_s7 = inlined_call_operand.hbm [shape: s32[1,8], index: 7, kind: output, shape index: {}]  }
   0x1   :  { %v12_v0 = vstv %s501_s6 }
   0x2   :  { %13 = vst [vmem:[#allocation3] sm:$0x1] %v12_v0 }
   0x3   :  { %14 = vsyncpa [#allocation5], 0 }
   0x4   :  { %15 = vsyncpa [#allocation8], 0 }
   0x5   :  { %16 = vsyncpa [#allocation11], 0  ;;  %s34_s28 = sshll.u32 %s496_s1, 4  ;;  %s35_s28 = int_to_ptr.hbm [resolvable:$true] %s34_s28 }
   0x6   :  { %17 = vsyncpa [#allocation6], 0  ;;  %s419_s29 = smov [#allocation7]   ;;  %s23_s10 = sshll.u32 %s495_s0, 4  ;;  %s24_s10 = int_to_ptr.hbm [resolvable:$true] %s23_s10 }
   0x7   :  { %s36_s30 = sshll.u32 %s419_s29, 4  ;;  %s420_s6 = smov [#allocation4]   ;;  %s37_s30 = int_to_ptr.vmem [resolvable:$true] %s36_s30 }
   0x8   :  { %39 = dma.hbm_to_vmem [thread:$0]  %s35_s28, 128, %s37_s30, [#allocation8]  }
   0x9   :  { %s25_s11 = sshll.u32 %s420_s6, 4  ;;  %s44_s14 = sshll.u32 %s497_s2, 4  ;;  %s26_s11 = int_to_ptr.vmem [resolvable:$true] %s25_s11  ;;  %s45_s14 = int_to_ptr.hbm [resolvable:$true] %s44_s14 }
   0xa   :  { %28 = dma.hbm_to_vmem [thread:$0]  %s24_s10, 128, %s26_s11, [#allocation5]  }
   0xb   :  { %s421_s1 = smov [#allocation9]   ;;  %s57_s18 = sshll.u32 %s498_s3, 4  ;;  %s58_s18 = int_to_ptr.hbm [resolvable:$true] %s57_s18 }
   0xc   :  { %s46_s15 = sshll.u32 %s421_s1, 4  ;;  %s422_s19 = smov 64   ;;  %s47_s15 = int_to_ptr.vmem [resolvable:$true] %s46_s15 }
   0xd   :  { %s423_s0 = smov 4   ;;  %s424_s20 = smov [#allocation10]  }
   0xe   :  { %52 = dma.hbm_to_vmem [thread:$0]  %s45_s14, 128, %s47_s15, [#allocation8], %s422_s19, %s422_s19, %s423_s0  }
   0xf   :  { %s59_s21 = sshll.u32 %s424_s20, 4  ;;  %s60_s21 = int_to_ptr.vmem [resolvable:$true] %s59_s21 }
  0x10   :  { %65 = dma.hbm_to_vmem [thread:$0]  %s58_s18, 128, %s60_s21, [#allocation11], %s422_s19, %s422_s19, %s423_s0  }
  0x11   :  { %411 = dma.done.wait [#allocation5], 128  }
  0x12   :  { %412 = vsyncadd [#allocation5], 4294967168 }
  0x13   :  { %413 = dma.done.wait [#allocation8], 256  }
  0x14   :  { %414 = vsyncadd [#allocation8], 4294967040 }
  0x15   :  { %415 = dma.done.wait [#allocation11], 128  }
  0x16   :  { %416 = vsyncadd [#allocation11], 4294967168  ;;  %v277_v1 = vld [vmem:[#allocation10] sm:$0xff]  ;;  %v276_v2 = vld [vmem:[#allocation9] sm:$0xff]  ;;  %vm109_vm0 = vcmask 130048   ;;  %vm93_vm1 = vcmask 57344  }
  0x17   :  { %v97_v3 = vld [vmem:[#allocation7] sm:$0xff]  ;;  %v95_v5 = vld [vmem:[#allocation4] sm:$0xff]  ;;  %120 = vmatpush.bf16.msra.mxu0 %v277_v1  ;;  %142 = vmatpush.bf16.msra.mxu1 %v276_v2  ;;  %v288_v7 = vld [vmem:[%s499_s4] ss:$0 sm:$0xff]  ;;  %v425_v33 = vmov 0   ;;  %v426_v35 = vmov 0.0  }
  0x18   :  { %v98_v4 = vpack.c.bf16 %v97_v3, %v97_v3  ;;  %v96_v6 = vpack.c.bf16 %v95_v5, %v95_v5  ;;  %v233_v32 = vld [vmem:[#allocation3] sm:$0x1]  ;;  %287 = vset.pattern.permute.xlu0 %v425_v33  ;;  %94 = vst.msk [vmem:[#allocation2] sm:$0x1] %vm93_vm1, %v426_v35  ;;  %vm199_vm6 = vcmask 261120   ;;  %s427_s23 = smov [#allocation12]  }
  0x19   :  { %236 = vperm.xlu0 %287, %v233_v32   ;;  %v198_v56 = vld [vmem:[%s500_s5] sm:$0x1]  ;;  %s249_s24 = sshll.u32 %s427_s23, 4  ;;  %s251_s27 = sshll.u32 %s502_s7, 4  ;;  %s250_s24 = int_to_ptr.vmem [resolvable:$true] %s249_s24  ;;  %s252_s27 = int_to_ptr.hbm [resolvable:$true] %s251_s27 }
  0x1a   :  { %267 = vmatmul.msk.bf16.vlgmr.msra.gmra.mxu0 %vm109_vm0, %v98_v4  ;;  %272 = vmatmul.msk.bf16.vlgmr.msra.gmra.mxu1 %vm109_vm0, %v96_v6 }
  0x1f   :  { %v197_v57 = vld [vmem:[#allocation2] sm:$0x1] }
  0x8b   :  { %v237_v60 = vpop.permute.xlu0 %236 }
  0x8c   :  { %v239_v61 = vperm.slane %v237_v60, 0 }
  0x97   :  { %v122_v8 = vpop.f32.mrf.mxu0  ;;  %v144_v9 = vpop.f32.mrf.mxu1 }
  0x98   :  { %v145_v10 = vadd.f32 %v144_v9, %v122_v8 }
  0x9a   :  { %v152_v11 = vadd.f32 %v288_v7, %v145_v10 }
  0x9c   :  { %v154_v12 = vmul.f32 0.70710677, %v152_v11  ;;  %v153_v53 = vmul.f32 0.5, %v152_v11 }
  0x9e   :  { %v155_v13 = vmul.f32 %v154_v12, %v154_v12 }
  0x9f   :  { %v124_v14 = vpop.f32.mrf.mxu0  ;;  %v146_v15 = vpop.f32.mrf.mxu1 }
  0xa0   :  { %v156_v16 = vmin.f32 %v155_v13, 16.0 }
  0xa2   :  { %v157_v17 = vmul.f32 2.1237322e-06, %v156_v16  ;;  %v168_v18 = vmul.f32 3.8918573e-05, %v156_v16 }
  0xa4   :  { %v158_v19 = vadd.f32 0.00028619796, %v157_v17  ;;  %v169_v20 = vadd.f32 0.001143296, %v168_v18 }
  0xa6   :  { %v159_v21 = vmul.f32 %v158_v19, %v156_v16  ;;  %v170_v22 = vmul.f32 %v169_v20, %v156_v16 }
  0xa8   :  { %v171_v23 = vadd.f32 0.014752088, %v170_v22  ;;  %v160_v24 = vadd.f32 0.0036580483, %v159_v21 }
  0xaa   :  { %v172_v25 = vmul.f32 %v171_v23, %v156_v16  ;;  %v161_v27 = vmul.f32 %v160_v24, %v156_v16 }
  0xac   :  { %v173_v26 = vadd.f32 0.112945676, %v172_v25  ;;  %v162_v30 = vadd.f32 0.05243302, %v161_v27 }
  0xae   :  { %v174_v28 = vmul.f32 %v173_v26, %v156_v16  ;;  %v163_v36 = vmul.f32 %v162_v30, %v156_v16 }
  0xb0   :  { %v175_v29 = vadd.f32 0.4994258, %v174_v28  ;;  %v164_v37 = vadd.f32 0.18741608, %v163_v36 }
  0xb2   :  { %v176_v31 = vmul.f32 %v175_v29, %v156_v16  ;;  %v165_v39 = vmul.f32 %v164_v37, %v156_v16 }
  0xb4   :  { %v177_v34 = vadd.f32 1.0, %v176_v31  ;;  %v166_v43 = vadd.f32 1.1283791, %v165_v39 }
  0xb6   :  { %289 = vrcp.f32 %v177_v34  ;;  %v189_v42 = vand.u32 2147483648, %v177_v34  ;;  %v187_v45 = vand.u32 2147483647, %v177_v34  ;;  %vm183_vm3 = vweird.f32 %v177_v34 }
  0xb7   :  { %v167_v48 = vmul.f32 %v166_v43, %v154_v12 }
  0xb8   :  { %v190_v47 = vor.u32 1.1754944e-38, %v189_v42  ;;  %vm188_vm5 = vcmp.eq.f32.partialorder %v187_v45, 8.507059e+37 }
  0xbc   :  { %v290_v38 = vpop.eup %289 }
  0xbd   :  { %v179_v40 = vmul.f32 %v290_v38, %v177_v34  ;;  %vm184_vm2 = vweird.f32 %v290_v38 }
  0xbe   :  { %vm185_vm4 = vmor %vm183_vm3, %vm184_vm2 }
  0xbf   :  { %v180_v41 = vsub.f32 1.0, %v179_v40 }
  0xc1   :  { %v181_v44 = vmul.f32 %v290_v38, %v180_v41 }
  0xc3   :  { %v182_v46 = vadd.f32 %v290_v38, %v181_v44 }
  0xc5   :  { %v186_v49 = vsel %vm185_vm4, %v290_v38, %v182_v46 }
  0xc6   :  { %v191_v50 = vsel %vm188_vm5, %v190_v47, %v186_v49 }
  0xc7   :  { %v192_v51 = vmul.f32 %v191_v50, %v167_v48 }
  0xc9   :  { %v273_v52 = vclamps-f32 %v192_v51, 1.0 }
  0xcb   :  { %v195_v54 = vadd.f32 1.0, %v273_v52 }
  0xcd   :  { %v196_v55 = vmul.f32 %v195_v54, %v153_v53 }
  0xcf   :  { %274 = vmatpush.xpose.msk.msra.mxu2 %vm199_vm6, %v196_v55 }
  0xd2   :  { %275 = vmatmul.msk.f32.vlgmr.msra.gmra.mxu2 %vm199_vm6, %v198_v56 }
 0x155   :  { %v223_v58 = vpop.f32.mrf.mxu2 }
 0x156   :  { %v226_v59 = vadd.f32 %v223_v58, %v197_v57 }
 0x158   :  { %228 = vst.msk [vmem:[#allocation2] sm:$0x1] %vm93_vm1, %v226_v59 }
 0x15f   :  { %v232_v62 = vld [vmem:[#allocation2] sm:$0x1] }
 0x160   :  { %v240_v63 = vadd.f32 %v239_v61, %v232_v62 }
 0x162   :  { %vm241_vm7 = vcmp.gt.f32.partialorder %v240_v63, 0.0 }
 0x163   :  { %v242_v0 = vsel %vm241_vm7, 1, %v425_v33 }
 0x164   :  { %243 = vst.msk [vmem:[#allocation12] sm:$0x1] %vm93_vm1, %v242_v0 }
 0x165   :  { %254 = dma.vmem_to_hbm [thread:$0]  %s250_s24, 16, %s252_s27, [#allocation6]  }
 0x166   :  { %417 = dma.done.wait [#allocation6], 16  }
 0x167   :  { %418 = vsyncadd [#allocation6], 4294967280 }
 0x168   :  { %259 = vsyncpa [#allocation5], 1 }
 0x169   :  { %260 = vsyncpa [#allocation8], 1 }
 0x16a   :  { %261 = vsyncpa [#allocation11], 1 }
 0x16b   :  { %262 = vsyncpa [#allocation6], 1 }

// kernel: tpu_custom_call.1
= control target key start
LH: loop header
LB: loop body
LE: loop exit
PB: predicated region body
PF: predicated region fallthrough
CT: control target
= control target key end

     0   :  { %s495_s0 = inlined_call_operand.hbm [shape: f32[8,16], index: 0, kind: input, shape index: {}]   ;;  %s496_s1 = inlined_call_operand.hbm [shape: f32[8,16], index: 1, kind: input, shape index: {}]   ;;  %s497_s2 = inlined_call_operand.hbm [shape: bf16[16,32], index: 2, kind: input, shape index: {}]   ;;  %s498_s3 = inlined_call_operand.hbm [shape: bf16[16,32], index: 3, kind: input, shape index: {}]   ;;  %s499_s4 = inlined_call_operand.vmem [shape: f32[1,32], index: 4, kind: input, shape index: {}]   ;;  %s500_s5 = inlined_call_operand.vmem [shape: f32[1,32], index: 5, kind: input, shape index: {}]   ;;  %s501_s6 = inlined_call_operand.<no memory space> [shape: f32[1,1], index: 6, kind: input, shape index: {}]   ;;  %s502_s7 = inlined_call_operand.hbm [shape: s32[1,8], index: 7, kind: output, shape index: {}]  }
   0x1   :  { %v12_v0 = vstv %s501_s6 }
   0x2   :  { %13 = vst [vmem:[#allocation3] sm:$0x1] %v12_v0 }
   0x3   :  { %14 = vsyncpa [#allocation5], 0 }
   0x4   :  { %15 = vsyncpa [#allocation8], 0 }
   0x5   :  { %16 = vsyncpa [#allocation11], 0  ;;  %s34_s28 = sshll.u32 %s496_s1, 4  ;;  %s35_s28 = int_to_ptr.hbm [resolvable:$true] %s34_s28 }
   0x6   :  { %17 = vsyncpa [#allocation6], 0  ;;  %s419_s29 = smov [#allocation7]   ;;  %s23_s10 = sshll.u32 %s495_s0, 4  ;;  %s24_s10 = int_to_ptr.hbm [resolvable:$true] %s23_s10 }
   0x7   :  { %s36_s30 = sshll.u32 %s419_s29, 4  ;;  %s420_s6 = smov [#allocation4]   ;;  %s37_s30 = int_to_ptr.vmem [resolvable:$true] %s36_s30 }
   0x8   :  { %39 = dma.hbm_to_vmem [thread:$0]  %s35_s28, 128, %s37_s30, [#allocation8]  }
   0x9   :  { %s25_s11 = sshll.u32 %s420_s6, 4  ;;  %s44_s14 = sshll.u32 %s497_s2, 4  ;;  %s26_s11 = int_to_ptr.vmem [resolvable:$true] %s25_s11  ;;  %s45_s14 = int_to_ptr.hbm [resolvable:$true] %s44_s14 }
   0xa   :  { %28 = dma.hbm_to_vmem [thread:$0]  %s24_s10, 128, %s26_s11, [#allocation5]  }
   0xb   :  { %s421_s1 = smov [#allocation9]   ;;  %s57_s18 = sshll.u32 %s498_s3, 4  ;;  %s58_s18 = int_to_ptr.hbm [resolvable:$true] %s57_s18 }
   0xc   :  { %s46_s15 = sshll.u32 %s421_s1, 4  ;;  %s422_s19 = smov 64   ;;  %s47_s15 = int_to_ptr.vmem [resolvable:$true] %s46_s15 }
   0xd   :  { %s423_s0 = smov 4   ;;  %s424_s20 = smov [#allocation10]  }
   0xe   :  { %52 = dma.hbm_to_vmem [thread:$0]  %s45_s14, 128, %s47_s15, [#allocation8], %s422_s19, %s422_s19, %s423_s0  }
   0xf   :  { %s59_s21 = sshll.u32 %s424_s20, 4  ;;  %s60_s21 = int_to_ptr.vmem [resolvable:$true] %s59_s21 }
  0x10   :  { %65 = dma.hbm_to_vmem [thread:$0]  %s58_s18, 128, %s60_s21, [#allocation11], %s422_s19, %s422_s19, %s423_s0  }
  0x11   :  { %411 = dma.done.wait [#allocation5], 128  }
  0x12   :  { %412 = vsyncadd [#allocation5], 4294967168 }
  0x13   :  { %413 = dma.done.wait [#allocation8], 256  }
  0x14   :  { %414 = vsyncadd [#allocation8], 4294967040 }
  0x15   :  { %415 = dma.done.wait [#allocation11], 128  }
  0x16   :  { %416 = vsyncadd [#allocation11], 4294967168  ;;  %v277_v1 = vld [vmem:[#allocation10] sm:$0xff]  ;;  %v276_v2 = vld [vmem:[#allocation9] sm:$0xff]  ;;  %vm109_vm0 = vcmask 130048   ;;  %vm93_vm1 = vcmask 57344  }
  0x17   :  { %v97_v3 = vld [vmem:[#allocation7] sm:$0xff]  ;;  %v95_v5 = vld [vmem:[#allocation4] sm:$0xff]  ;;  %120 = vmatpush.bf16.msra.mxu0 %v277_v1  ;;  %142 = vmatpush.bf16.msra.mxu1 %v276_v2  ;;  %v288_v7 = vld [vmem:[%s499_s4] ss:$0 sm:$0xff]  ;;  %v425_v33 = vmov 0   ;;  %v426_v35 = vmov 0.0  }
  0x18   :  { %v98_v4 = vpack.c.bf16 %v97_v3, %v97_v3  ;;  %v96_v6 = vpack.c.bf16 %v95_v5, %v95_v5  ;;  %v233_v32 = vld [vmem:[#allocation3] sm:$0x1]  ;;  %287 = vset.pattern.permute.xlu0 %v425_v33  ;;  %94 = vst.msk [vmem:[#allocation2] sm:$0x1] %vm93_vm1, %v426_v35  ;;  %vm199_vm6 = vcmask 261120   ;;  %s427_s23 = smov [#allocation12]  }
  0x19   :  { %236 = vperm.xlu0 %287, %v233_v32   ;;  %v198_v56 = vld [vmem:[%s500_s5] sm:$0x1]  ;;  %s249_s24 = sshll.u32 %s427_s23, 4  ;;  %s251_s27 = sshll.u32 %s502_s7, 4  ;;  %s250_s24 = int_to_ptr.vmem [resolvable:$true] %s249_s24  ;;  %s252_s27 = int_to_ptr.hbm [resolvable:$true] %s251_s27 }
  0x1a   :  { %267 = vmatmul.msk.bf16.vlgmr.msra.gmra.mxu0 %vm109_vm0, %v98_v4  ;;  %272 = vmatmul.msk.bf16.vlgmr.msra.gmra.mxu1 %vm109_vm0, %v96_v6 }
  0x1f   :  { %v197_v57 = vld [vmem:[#allocation2] sm:$0x1] }
  0x8b   :  { %v237_v60 = vpop.permute.xlu0 %236 }
  0x8c   :  { %v239_v61 = vperm.slane %v237_v60, 0 }
  0x97   :  { %v122_v8 = vpop.f32.mrf.mxu0  ;;  %v144_v9 = vpop.f32.mrf.mxu1 }
  0x98   :  { %v145_v10 = vadd.f32 %v144_v9, %v122_v8 }
  0x9a   :  { %v152_v11 = vadd.f32 %v288_v7, %v145_v10 }
  0x9c   :  { %v154_v12 = vmul.f32 0.70710677, %v152_v11  ;;  %v153_v53 = vmul.f32 0.5, %v152_v11 }
  0x9e   :  { %v155_v13 = vmul.f32 %v154_v12, %v154_v12 }
  0x9f   :  { %v124_v14 = vpop.f32.mrf.mxu0  ;;  %v146_v15 = vpop.f32.mrf.mxu1 }
  0xa0   :  { %v156_v16 = vmin.f32 %v155_v13, 16.0 }
  0xa2   :  { %v157_v17 = vmul.f32 2.1237322e-06, %v156_v16  ;;  %v168_v18 = vmul.f32 3.8918573e-05, %v156_v16 }
  0xa4   :  { %v158_v19 = vadd.f32 0.00028619796, %v157_v17  ;;  %v169_v20 = vadd.f32 0.001143296, %v168_v18 }
  0xa6   :  { %v159_v21 = vmul.f32 %v158_v19, %v156_v16  ;;  %v170_v22 = vmul.f32 %v169_v20, %v156_v16 }
  0xa8   :  { %v171_v23 = vadd.f32 0.014752088, %v170_v22  ;;  %v160_v24 = vadd.f32 0.0036580483, %v159_v21 }
  0xaa   :  { %v172_v25 = vmul.f32 %v171_v23, %v156_v16  ;;  %v161_v27 = vmul.f32 %v160_v24, %v156_v16 }
  0xac   :  { %v173_v26 = vadd.f32 0.112945676, %v172_v25  ;;  %v162_v30 = vadd.f32 0.05243302, %v161_v27 }
  0xae   :  { %v174_v28 = vmul.f32 %v173_v26, %v156_v16  ;;  %v163_v36 = vmul.f32 %v162_v30, %v156_v16 }
  0xb0   :  { %v175_v29 = vadd.f32 0.4994258, %v174_v28  ;;  %v164_v37 = vadd.f32 0.18741608, %v163_v36 }
  0xb2   :  { %v176_v31 = vmul.f32 %v175_v29, %v156_v16  ;;  %v165_v39 = vmul.f32 %v164_v37, %v156_v16 }
  0xb4   :  { %v177_v34 = vadd.f32 1.0, %v176_v31  ;;  %v166_v43 = vadd.f32 1.1283791, %v165_v39 }
  0xb6   :  { %289 = vrcp.f32 %v177_v34  ;;  %v189_v42 = vand.u32 2147483648, %v177_v34  ;;  %v187_v45 = vand.u32 2147483647, %v177_v34  ;;  %vm183_vm3 = vweird.f32 %v177_v34 }
  0xb7   :  { %v167_v48 = vmul.f32 %v166_v43, %v154_v12 }
  0xb8   :  { %v190_v47 = vor.u32 1.1754944e-38, %v189_v42  ;;  %vm188_vm5 = vcmp.eq.f32.partialorder %v187_v45, 8.507059e+37 }
  0xbc   :  { %v290_v38 = vpop.eup %289 }
  0xbd   :  { %v179_v40 = vmul.f32 %v290_v38, %v177_v34  ;;  %vm184_vm2 = vweird.f32 %v290_v38 }
  0xbe   :  { %vm185_vm4 = vmor %vm183_vm3, %vm184_vm2 }
  0xbf   :  { %v180_v41 = vsub.f32 1.0, %v179_v40 }
  0xc1   :  { %v181_v44 = vmul.f32 %v290_v38, %v180_v41 }
  0xc3   :  { %v182_v46 = vadd.f32 %v290_v38, %v181_v44 }
  0xc5   :  { %v186_v49 = vsel %vm185_vm4, %v290_v38, %v182_v46 }
  0xc6   :  { %v191_v50 = vsel %vm188_vm5, %v190_v47, %v186_v49 }
  0xc7   :  { %v192_v51 = vmul.f32 %v191_v50, %v167_v48 }
  0xc9   :  { %v273_v52 = vclamps-f32 %v192_v51, 1.0 }
  0xcb   :  { %v195_v54 = vadd.f32 1.0, %v273_v52 }
  0xcd   :  { %v196_v55 = vmul.f32 %v195_v54, %v153_v53 }
  0xcf   :  { %274 = vmatpush.xpose.msk.msra.mxu2 %vm199_vm6, %v196_v55 }
  0xd2   :  { %275 = vmatmul.msk.f32.vlgmr.msra.gmra.mxu2 %vm199_vm6, %v198_v56 }
 0x155   :  { %v223_v58 = vpop.f32.mrf.mxu2 }
 0x156   :  { %v226_v59 = vadd.f32 %v223_v58, %v197_v57 }
 0x158   :  { %228 = vst.msk [vmem:[#allocation2] sm:$0x1] %vm93_vm1, %v226_v59 }
 0x15f   :  { %v232_v62 = vld [vmem:[#allocation2] sm:$0x1] }
 0x160   :  { %v240_v63 = vadd.f32 %v239_v61, %v232_v62 }
 0x162   :  { %vm241_vm7 = vcmp.gt.f32.partialorder %v240_v63, 0.0 }
 0x163   :  { %v242_v0 = vsel %vm241_vm7, 1, %v425_v33 }
 0x164   :  { %243 = vst.msk [vmem:[#allocation12] sm:$0x1] %vm93_vm1, %v242_v0 }
 0x165   :  { %254 = dma.vmem_to_hbm [thread:$0]  %s250_s24, 16, %s252_s27, [#allocation6]  }
 0x166   :  { %417 = dma.done.wait [#allocation6], 16  }
 0x167   :  { %418 = vsyncadd [#allocation6], 4294967280 }
 0x168   :  { %259 = vsyncpa [#allocation5], 1 }
 0x169   :  { %260 = vsyncpa [#allocation8], 1 }
 0x16a   :  { %261 = vsyncpa [#allocation11], 1 }
 0x16b   :  { %262 = vsyncpa [#allocation6], 1 }

</bundles_post_ra>
